<compile_context>
chip_gen: v7x
topology: tpu7x:2x2x1
jax: 0.10.0
libtpu: 0.0.40
codegen_flags: <defaults>
</compile_context>

<pallas_src>
import jax
import jax.numpy as jnp
from jax import lax
from jax.experimental import pallas as pl
from jax.experimental.pallas import tpu as pltpu

EPS = 1e-5  # nn.BatchNorm2d default eps


def _double_conv_kernel(xpad_ref, w1t_ref, g1_ref, be1_ref,
                        w2t_ref, g2_ref, be2_ref, fold_ref, out_ref):
    N, Hp, _ = xpad_ref.shape
    H = Hp - 2
    Cout = g1_ref.shape[1]
    WCout = w1t_ref.shape[2]
    W = WCout // Cout
    Wp = W + 2
    npix = N * H * W
    inv_n = 1.0 / float(npix)
    fold = fold_ref[...]                        # (W*Cout, Cout) 0/1 selector, f32

    def conv3x3(padded, wt_ref):
        # padded: (N, Hp, Wp*C) bf16; wt_ref: (3, Wp*C, W*Cout) bf16.
        # Three banded matmuls (one per kh); the kw shifts and the im2col
        # interleave live inside the weight matrix, so every MXU operand is a
        # lane-dense row slab and no narrow/misaligned relayouts are needed.
        acc = None
        for kh in range(3):
            x_kh = padded[:, kh:kh + H, :].reshape(N * H, padded.shape[2])
            part = jnp.dot(x_kh, wt_ref[kh],
                           preferred_element_type=jnp.float32)
            acc = part if acc is None else acc + part
        return acc                                          # (N*H, W*Cout) f32

    def bn_relu(acc, g_ref, be_ref):
        # Train-mode BatchNorm (biased variance, one-pass stats) + ReLU, all in
        # the lane-dense (N*H, W*Cout) layout.  Math stays f32 throughout; the
        # per-channel fold of the column sums is a tiny selector matmul on the
        # otherwise-idle MXU.
        col_s = jnp.sum(acc, axis=0, keepdims=True)                # (1, W*Cout)
        col_ss = jnp.sum(acc * acc, axis=0, keepdims=True)         # (1, W*Cout)
        s = jnp.dot(col_s, fold, preferred_element_type=jnp.float32)    # (1, Cout)
        ss = jnp.dot(col_ss, fold, preferred_element_type=jnp.float32)  # (1, Cout)
        mean = s * inv_n
        var = jnp.maximum(ss * inv_n - mean * mean, 0.0)    # biased var (torch)
        scale = g_ref[...] * lax.rsqrt(var + EPS)
        shift = be_ref[...] - mean * scale
        scale_w = jnp.tile(scale, (1, W))                           # (1, W*Cout)
        shift_w = jnp.tile(shift, (1, W))
        return jnp.maximum(acc * scale_w + shift_w, 0.0)    # BN + ReLU fused

    # ---------------- conv1 -> BN1 -> ReLU -----------------------------------
    h1 = bn_relu(conv3x3(xpad_ref[...], w1t_ref), g1_ref, be1_ref)

    # In-register zero padding of the intermediate (NHWC kept as lane-dense 2D
    # rows); replaces the previous masked-halo scratch round trip.
    h1b = h1.astype(jnp.bfloat16).reshape(N, H, WCout)
    zc = jnp.zeros((N, H, Cout), jnp.bfloat16)
    rows = jnp.concatenate([zc, h1b, zc], axis=2)           # (N, H,  Wp*Cout)
    zr = jnp.zeros((N, 1, Wp * Cout), jnp.bfloat16)
    h1p = jnp.concatenate([zr, rows, zr], axis=1)           # (N, Hp, Wp*Cout)

    # ---------------- conv2 -> BN2 -> ReLU -----------------------------------
    y = bn_relu(conv3x3(h1p, w2t_ref), g2_ref, be2_ref)

    # Lane-dense store: minor dim W*Cout (= 128 for the test shape).
    out_ref[...] = y.astype(out_ref.dtype)


def _band_weights(w_hwio, W):
    """Fold a 3x3 conv's kw taps + im2col interleave into 3 banded matrices.

    Returns (3, Wp*C, W*Cout) bf16 with
        [kh, (w+kw)*C + ci, w*Cout + co] = w_hwio[kh, kw, ci, co]
    (zero elsewhere), so   out_row = sum_kh  in_row(kh) @ band[kh].
    """
    _, Kw, C, Co = w_hwio.shape
    Wp = W + 2
    idx = jnp.arange(W)
    mats = []
    for kh in range(3):
        m = jnp.zeros((W, Wp, C, Co), jnp.float32)
        for kw in range(Kw):
            m = m.at[idx, idx + kw].set(w_hwio[kh, kw])
        mats.append(m.transpose(1, 2, 0, 3).reshape(Wp * C, W * Co))
    return jnp.stack(mats).astype(jnp.bfloat16)


@jax.jit
def double_conv_forward(x_nchw, w1, b1, g1, be1, w2, b2, g2, be2):
    """x_nchw: (N, Cin, H, W) f32.  Weights HWIO: w1 (3,3,Cin,Cout), w2 (3,3,Cout,Cout).

    b1/b2 are accepted for interface parity with nn.Conv2d but are unused:
    a per-channel constant bias cancels exactly under train-mode BatchNorm.
    """
    del b1, b2
    N, Cin, H, W = x_nchw.shape
    Cout = w1.shape[-1]
    Hp, Wp = H + 2, W + 2

    # Layout glue + zero padding (padding=1) in plain JAX; data path in bf16.
    # TODO(synk): fold this transpose/pad and the output transpose into the
    # gridded kernel's index_map/halo handling for real shapes (each is an
    # extra HBM pass over the activations there).
    x_nhwc = jnp.transpose(x_nchw, (0, 2, 3, 1))
    xpad = jnp.pad(x_nhwc, ((0, 0), (1, 1), (1, 1), (0, 0)))
    xpad = xpad.reshape(N, Hp, Wp * Cin).astype(jnp.bfloat16)

    w1t = _band_weights(w1, W)                     # (3, Wp*Cin,  W*Cout) bf16
    w2t = _band_weights(w2, W)                     # (3, Wp*Cout, W*Cout) bf16
    fold = jnp.tile(jnp.eye(Cout, dtype=jnp.float32), (W, 1))   # (W*Cout, Cout)
    row = lambda v: v.reshape(1, Cout).astype(jnp.float32)

    vmem = pl.BlockSpec(memory_space=pltpu.MemorySpace.VMEM)
    flops = 2 * N * H * 3 * Wp * W * Cout * (Cin + Cout)
    bytes_accessed = (xpad.size * 2 + (w1t.size + w2t.size) * 2
                      + fold.size * 4 + 4 * Cout * 4 + N * H * W * Cout * 4)

    y2d = pl.pallas_call(
        _double_conv_kernel,
        out_shape=jax.ShapeDtypeStruct((N * H, W * Cout), jnp.float32),
        in_specs=[vmem] * 8,
        out_specs=vmem,
        compiler_params=pltpu.CompilerParams(
            # Tiny at these shapes; the gridded real-shape version should
            # budget per generation (v7x <= ~48 MiB, v6e/v5e up to ~100 MiB).
            vmem_limit_bytes=32 * 1024 * 1024),
        cost_estimate=pl.CostEstimate(
            flops=flops, transcendentals=2 * Cout,
            bytes_accessed=bytes_accessed),
    )(xpad, w1t, row(g1), row(be1), w2t, row(g2), row(be2), fold)

    y_nhwc = y2d.reshape(N, H, W, Cout)
    return jnp.transpose(y_nhwc, (0, 3, 1, 2))     # back to NCHW


def _reference_f32(x, w1, b1, g1, be1, w2, b2, g2, be2):
    """Pure-JAX f32 reference (PyTorch train-mode BatchNorm semantics)."""
    xh = jnp.transpose(x, (0, 2, 3, 1))
    dn = ('NHWC', 'HWIO', 'NHWC')

    def block(x, w, b, g, be):
        y = lax.conv_general_dilated(x, w, (1, 1), 'SAME',
                                     dimension_numbers=dn) + b
        m = jnp.mean(y, axis=(0, 1, 2), keepdims=True)
        v = jnp.mean((y - m) ** 2, axis=(0, 1, 2), keepdims=True)
        return jnp.maximum((y - m) * lax.rsqrt(v + EPS) * g + be, 0.0)

    y = block(xh, w1, b1, g1, be1)
    y = block(y, w2, b2, g2, be2)
    return jnp.transpose(y, (0, 3, 1, 2))


def _reference_bf16(x, w1, b1, g1, be1, w2, b2, g2, be2):
    """Reference applying the same bf16-at-the-MXU rounding as the kernel.

    The conv bias is kept here (PyTorch semantics); it must cancel under
    train-mode BatchNorm, so the bias-free kernel still matches tightly.
    """
    xh = jnp.transpose(x, (0, 2, 3, 1))

    def conv3x3(xh, w, b):
        N, H, W, C = xh.shape
        Cout = w.shape[-1]
        xp = jnp.pad(xh, ((0, 0), (1, 1), (1, 1), (0, 0))).astype(jnp.bfloat16)
        taps = [xp[:, kh:kh + H, kw:kw + W, :]
                for kh in range(3) for kw in range(3)]
        col = jnp.concatenate(taps, axis=-1).reshape(N * H * W, 9 * C)
        wf = w.reshape(9 * C, Cout).astype(jnp.bfloat16)
        y = jnp.dot(col, wf, preferred_element_type=jnp.float32) + b
        return y.reshape(N, H, W, Cout)

    def bn_relu(y, g, be):
        m = jnp.mean(y, axis=(0, 1, 2), keepdims=True)
        v = jnp.mean((y - m) ** 2, axis=(0, 1, 2), keepdims=True)
        return jnp.maximum((y - m) * lax.rsqrt(v + EPS) * g + be, 0.0)

    y = bn_relu(conv3x3(xh, w1, b1), g1, be1)
    y = bn_relu(conv3x3(y, w2, b2), g2, be2)
    return jnp.transpose(y, (0, 3, 1, 2))


if __name__ == "__main__":
    N, Cin, Cout, H, W = 2, 4, 8, 16, 16

    key = jax.random.PRNGKey(0)
    k = jax.random.split(key, 5)
    x = jax.random.normal(k[0], (N, Cin, H, W), jnp.float32)

    # Parameter shapes match nn.Conv2d (HWIO here) / nn.BatchNorm2d defaults.
    w1 = jax.random.normal(k[1], (3, 3, Cin, Cout), jnp.float32) * 0.2
    b1 = jax.random.normal(k[2], (Cout,), jnp.float32) * 0.1
    w2 = jax.random.normal(k[3], (3, 3, Cout, Cout), jnp.float32) * 0.2
    b2 = jax.random.normal(k[4], (Cout,), jnp.float32) * 0.1
    g1 = jnp.ones((Cout,), jnp.float32)
    be1 = jnp.zeros((Cout,), jnp.float32)
    g2 = jnp.ones((Cout,), jnp.float32)
    be2 = jnp.zeros((Cout,), jnp.float32)

    out = jax.block_until_ready(
        double_conv_forward(x, w1, b1, g1, be1, w2, b2, g2, be2))
    assert out.shape == (N, Cout, H, W)

    # Tight check vs. a reference with the same bf16-at-the-MXU rounding
    # (bias included there: it must cancel exactly under train-mode BN).
    # Tolerance covers one-ulp bf16 re-rounding of the intermediate caused by
    # differing f32 accumulation order between the banded and im2col matmuls.
    ref_bf16 = _reference_bf16(x, w1, b1, g1, be1, w2, b2, g2, be2)
    err_bf16 = float(jnp.max(jnp.abs(out - ref_bf16)))
    assert err_bf16 < 1e-2, err_bf16

    # Semantic check vs. the full-f32 reference (PyTorch parity); tolerance is
    # the expected bf16-MXU rounding envelope.
    ref_f32 = _reference_f32(x, w1, b1, g1, be1, w2, b2, g2, be2)
    err_f32 = float(jnp.max(jnp.abs(out - ref_f32)))
    assert err_f32 < 1e-1, err_f32

    print("KERNEL_OK")
</pallas_src>

<mosaic_0001>
module attributes {stable_mosaic.version = 11 : i64} {
  func.func @_double_conv_kernel(%arg0: memref<2x18x72xbf16, #tpu.memory_space<vmem>>, %arg1: memref<3x72x128xbf16, #tpu.memory_space<vmem>>, %arg2: memref<1x8xf32, #tpu.memory_space<vmem>>, %arg3: memref<1x8xf32, #tpu.memory_space<vmem>>, %arg4: memref<3x144x128xbf16, #tpu.memory_space<vmem>>, %arg5: memref<1x8xf32, #tpu.memory_space<vmem>>, %arg6: memref<1x8xf32, #tpu.memory_space<vmem>>, %arg7: memref<128x8xf32, #tpu.memory_space<vmem>>, %arg8: memref<32x128xf32, #tpu.memory_space<vmem>>) attributes {dimension_semantics = [], scalar_prefetch = 0 : i64, scratch_operands = 0 : i64, tpu.core_type = #tpu.core_type<tc>} {
    %c0 = arith.constant 0 : index
    %c0_0 = arith.constant 0 : index
    %0 = vector.load %arg7[%c0, %c0_0] : memref<128x8xf32, #tpu.memory_space<vmem>>, vector<128x8xf32>
    %c0_1 = arith.constant 0 : index
    %c0_2 = arith.constant 0 : index
    %c0_3 = arith.constant 0 : index
    %1 = vector.load %arg0[%c0_1, %c0_2, %c0_3] : memref<2x18x72xbf16, #tpu.memory_space<vmem>>, vector<2x18x72xbf16>
    %2 = vector.extract_strided_slice %1 {offsets = [0, 0, 0], sizes = [2, 16, 72], strides = [1, 1, 1]} : vector<2x18x72xbf16> to vector<2x16x72xbf16>
    %3 = vector.shape_cast %2 : vector<2x16x72xbf16> to vector<32x72xbf16>
    %c0_4 = arith.constant 0 : index
    %c0_5 = arith.constant 0 : index
    %c0_6 = arith.constant 0 : index
    %4 = vector.load %arg1[%c0_4, %c0_5, %c0_6] : memref<3x72x128xbf16, #tpu.memory_space<vmem>>, vector<1x72x128xbf16>
    %5 = vector.shape_cast %4 : vector<1x72x128xbf16> to vector<72x128xbf16>
    %cst = arith.constant dense<0.000000e+00> : vector<32x128xf32>
    %6 = tpu.matmul %3, %5, %cst {dimension_numbers = #tpu.dot_dimension_numbers<[1], [0], [0], [1], [0, 0, 1, 1], [], []>} : vector<32x72xbf16>, vector<72x128xbf16>, vector<32x128xf32> -> vector<32x128xf32>
    %7 = vector.extract_strided_slice %1 {offsets = [0, 1, 0], sizes = [2, 16, 72], strides = [1, 1, 1]} : vector<2x18x72xbf16> to vector<2x16x72xbf16>
    %8 = vector.shape_cast %7 : vector<2x16x72xbf16> to vector<32x72xbf16>
    %c1 = arith.constant 1 : index
    %c0_7 = arith.constant 0 : index
    %c0_8 = arith.constant 0 : index
    %9 = vector.load %arg1[%c1, %c0_7, %c0_8] : memref<3x72x128xbf16, #tpu.memory_space<vmem>>, vector<1x72x128xbf16>
    %10 = vector.shape_cast %9 : vector<1x72x128xbf16> to vector<72x128xbf16>
    %cst_9 = arith.constant dense<0.000000e+00> : vector<32x128xf32>
    %11 = tpu.matmul %8, %10, %cst_9 {dimension_numbers = #tpu.dot_dimension_numbers<[1], [0], [0], [1], [0, 0, 1, 1], [], []>} : vector<32x72xbf16>, vector<72x128xbf16>, vector<32x128xf32> -> vector<32x128xf32>
    %12 = arith.addf %6, %11 : vector<32x128xf32>
    %13 = vector.extract_strided_slice %1 {offsets = [0, 2, 0], sizes = [2, 16, 72], strides = [1, 1, 1]} : vector<2x18x72xbf16> to vector<2x16x72xbf16>
    %14 = vector.shape_cast %13 : vector<2x16x72xbf16> to vector<32x72xbf16>
    %c2 = arith.constant 2 : index
    %c0_10 = arith.constant 0 : index
    %c0_11 = arith.constant 0 : index
    %15 = vector.load %arg1[%c2, %c0_10, %c0_11] : memref<3x72x128xbf16, #tpu.memory_space<vmem>>, vector<1x72x128xbf16>
    %16 = vector.shape_cast %15 : vector<1x72x128xbf16> to vector<72x128xbf16>
    %cst_12 = arith.constant dense<0.000000e+00> : vector<32x128xf32>
    %17 = tpu.matmul %14, %16, %cst_12 {dimension_numbers = #tpu.dot_dimension_numbers<[1], [0], [0], [1], [0, 0, 1, 1], [], []>} : vector<32x72xbf16>, vector<72x128xbf16>, vector<32x128xf32> -> vector<32x128xf32>
    %18 = arith.addf %12, %17 : vector<32x128xf32>
    %cst_13 = arith.constant dense<0.000000e+00> : vector<128xf32>
    %19 = vector.multi_reduction <add>, %18, %cst_13 [0] : vector<32x128xf32> to vector<128xf32>
    %20 = vector.shape_cast %19 : vector<128xf32> to vector<1x128xf32>
    %21 = arith.mulf %18, %18 : vector<32x128xf32>
    %cst_14 = arith.constant dense<0.000000e+00> : vector<128xf32>
    %22 = vector.multi_reduction <add>, %21, %cst_14 [0] : vector<32x128xf32> to vector<128xf32>
    %23 = vector.shape_cast %22 : vector<128xf32> to vector<1x128xf32>
    %cst_15 = arith.constant dense<0.000000e+00> : vector<1x8xf32>
    %24 = tpu.matmul %20, %0, %cst_15 {dimension_numbers = #tpu.dot_dimension_numbers<[1], [0], [0], [1], [0, 0, 1, 1], [], []>} : vector<1x128xf32>, vector<128x8xf32>, vector<1x8xf32> -> vector<1x8xf32>
    %cst_16 = arith.constant dense<0.000000e+00> : vector<1x8xf32>
    %25 = tpu.matmul %23, %0, %cst_16 {dimension_numbers = #tpu.dot_dimension_numbers<[1], [0], [0], [1], [0, 0, 1, 1], [], []>} : vector<1x128xf32>, vector<128x8xf32>, vector<1x8xf32> -> vector<1x8xf32>
    %cst_17 = arith.constant 0.001953125 : f32
    %26 = vector.broadcast %cst_17 : f32 to vector<1x8xf32>
    %27 = arith.mulf %24, %26 : vector<1x8xf32>
    %cst_18 = arith.constant 0.001953125 : f32
    %28 = vector.broadcast %cst_18 : f32 to vector<1x8xf32>
    %29 = arith.mulf %25, %28 : vector<1x8xf32>
    %30 = arith.mulf %27, %27 : vector<1x8xf32>
    %31 = arith.subf %29, %30 : vector<1x8xf32>
    %cst_19 = arith.constant 0.000000e+00 : f32
    %32 = vector.broadcast %cst_19 : f32 to vector<1x8xf32>
    %33 = arith.maximumf %31, %32 : vector<1x8xf32>
    %c0_20 = arith.constant 0 : index
    %c0_21 = arith.constant 0 : index
    %34 = vector.load %arg2[%c0_20, %c0_21] : memref<1x8xf32, #tpu.memory_space<vmem>>, vector<1x8xf32>
    %cst_22 = arith.constant 9.99999974E-6 : f32
    %35 = vector.broadcast %cst_22 : f32 to vector<1x8xf32>
    %36 = arith.addf %33, %35 : vector<1x8xf32>
    %37 = math.rsqrt %36 : vector<1x8xf32>
    %38 = arith.mulf %34, %37 : vector<1x8xf32>
    %c0_23 = arith.constant 0 : index
    %c0_24 = arith.constant 0 : index
    %39 = vector.load %arg3[%c0_23, %c0_24] : memref<1x8xf32, #tpu.memory_space<vmem>>, vector<1x8xf32>
    %40 = arith.mulf %27, %38 : vector<1x8xf32>
    %41 = arith.subf %39, %40 : vector<1x8xf32>
    %42 = tpu.concatenate %38, %38, %38, %38, %38, %38, %38, %38, %38, %38, %38, %38, %38, %38, %38, %38 in 1 : vector<1x8xf32>, vector<1x8xf32>, vector<1x8xf32>, vector<1x8xf32>, vector<1x8xf32>, vector<1x8xf32>, vector<1x8xf32>, vector<1x8xf32>, vector<1x8xf32>, vector<1x8xf32>, vector<1x8xf32>, vector<1x8xf32>, vector<1x8xf32>, vector<1x8xf32>, vector<1x8xf32>, vector<1x8xf32> -> vector<1x128xf32>
    %43 = tpu.concatenate %41, %41, %41, %41, %41, %41, %41, %41, %41, %41, %41, %41, %41, %41, %41, %41 in 1 : vector<1x8xf32>, vector<1x8xf32>, vector<1x8xf32>, vector<1x8xf32>, vector<1x8xf32>, vector<1x8xf32>, vector<1x8xf32>, vector<1x8xf32>, vector<1x8xf32>, vector<1x8xf32>, vector<1x8xf32>, vector<1x8xf32>, vector<1x8xf32>, vector<1x8xf32>, vector<1x8xf32>, vector<1x8xf32> -> vector<1x128xf32>
    %44 = vector.broadcast %42 : vector<1x128xf32> to vector<32x128xf32>
    %45 = arith.mulf %18, %44 : vector<32x128xf32>
    %46 = vector.broadcast %43 : vector<1x128xf32> to vector<32x128xf32>
    %47 = arith.addf %45, %46 : vector<32x128xf32>
    %cst_25 = arith.constant 0.000000e+00 : f32
    %48 = vector.broadcast %cst_25 : f32 to vector<32x128xf32>
    %49 = arith.maximumf %47, %48 : vector<32x128xf32>
    %50 = arith.truncf %49 : vector<32x128xf32> to vector<32x128xbf16>
    %51 = vector.shape_cast %50 : vector<32x128xbf16> to vector<2x16x128xbf16>
    %cst_26 = arith.constant 0.000000e+00 : bf16
    %52 = vector.broadcast %cst_26 : bf16 to vector<2x16x8xbf16>
    %53 = tpu.concatenate %52, %51, %52 in 2 : vector<2x16x8xbf16>, vector<2x16x128xbf16>, vector<2x16x8xbf16> -> vector<2x16x144xbf16>
    %cst_27 = arith.constant 0.000000e+00 : bf16
    %54 = vector.broadcast %cst_27 : bf16 to vector<2x1x144xbf16>
    %55 = tpu.concatenate %54, %53, %54 in 1 : vector<2x1x144xbf16>, vector<2x16x144xbf16>, vector<2x1x144xbf16> -> vector<2x18x144xbf16>
    %56 = vector.extract_strided_slice %55 {offsets = [0, 0, 0], sizes = [2, 16, 144], strides = [1, 1, 1]} : vector<2x18x144xbf16> to vector<2x16x144xbf16>
    %57 = vector.shape_cast %56 : vector<2x16x144xbf16> to vector<32x144xbf16>
    %c0_28 = arith.constant 0 : index
    %c0_29 = arith.constant 0 : index
    %c0_30 = arith.constant 0 : index
    %58 = vector.load %arg4[%c0_28, %c0_29, %c0_30] : memref<3x144x128xbf16, #tpu.memory_space<vmem>>, vector<1x144x128xbf16>
    %59 = vector.shape_cast %58 : vector<1x144x128xbf16> to vector<144x128xbf16>
    %cst_31 = arith.constant dense<0.000000e+00> : vector<32x128xf32>
    %60 = tpu.matmul %57, %59, %cst_31 {dimension_numbers = #tpu.dot_dimension_numbers<[1], [0], [0], [1], [0, 0, 1, 1], [], []>} : vector<32x144xbf16>, vector<144x128xbf16>, vector<32x128xf32> -> vector<32x128xf32>
    %61 = vector.extract_strided_slice %55 {offsets = [0, 1, 0], sizes = [2, 16, 144], strides = [1, 1, 1]} : vector<2x18x144xbf16> to vector<2x16x144xbf16>
    %62 = vector.shape_cast %61 : vector<2x16x144xbf16> to vector<32x144xbf16>
    %c1_32 = arith.constant 1 : index
    %c0_33 = arith.constant 0 : index
    %c0_34 = arith.constant 0 : index
    %63 = vector.load %arg4[%c1_32, %c0_33, %c0_34] : memref<3x144x128xbf16, #tpu.memory_space<vmem>>, vector<1x144x128xbf16>
    %64 = vector.shape_cast %63 : vector<1x144x128xbf16> to vector<144x128xbf16>
    %cst_35 = arith.constant dense<0.000000e+00> : vector<32x128xf32>
    %65 = tpu.matmul %62, %64, %cst_35 {dimension_numbers = #tpu.dot_dimension_numbers<[1], [0], [0], [1], [0, 0, 1, 1], [], []>} : vector<32x144xbf16>, vector<144x128xbf16>, vector<32x128xf32> -> vector<32x128xf32>
    %66 = arith.addf %60, %65 : vector<32x128xf32>
    %67 = vector.extract_strided_slice %55 {offsets = [0, 2, 0], sizes = [2, 16, 144], strides = [1, 1, 1]} : vector<2x18x144xbf16> to vector<2x16x144xbf16>
    %68 = vector.shape_cast %67 : vector<2x16x144xbf16> to vector<32x144xbf16>
    %c2_36 = arith.constant 2 : index
    %c0_37 = arith.constant 0 : index
    %c0_38 = arith.constant 0 : index
    %69 = vector.load %arg4[%c2_36, %c0_37, %c0_38] : memref<3x144x128xbf16, #tpu.memory_space<vmem>>, vector<1x144x128xbf16>
    %70 = vector.shape_cast %69 : vector<1x144x128xbf16> to vector<144x128xbf16>
    %cst_39 = arith.constant dense<0.000000e+00> : vector<32x128xf32>
    %71 = tpu.matmul %68, %70, %cst_39 {dimension_numbers = #tpu.dot_dimension_numbers<[1], [0], [0], [1], [0, 0, 1, 1], [], []>} : vector<32x144xbf16>, vector<144x128xbf16>, vector<32x128xf32> -> vector<32x128xf32>
    %72 = arith.addf %66, %71 : vector<32x128xf32>
    %cst_40 = arith.constant dense<0.000000e+00> : vector<128xf32>
    %73 = vector.multi_reduction <add>, %72, %cst_40 [0] : vector<32x128xf32> to vector<128xf32>
    %74 = vector.shape_cast %73 : vector<128xf32> to vector<1x128xf32>
    %75 = arith.mulf %72, %72 : vector<32x128xf32>
    %cst_41 = arith.constant dense<0.000000e+00> : vector<128xf32>
    %76 = vector.multi_reduction <add>, %75, %cst_41 [0] : vector<32x128xf32> to vector<128xf32>
    %77 = vector.shape_cast %76 : vector<128xf32> to vector<1x128xf32>
    %cst_42 = arith.constant dense<0.000000e+00> : vector<1x8xf32>
    %78 = tpu.matmul %74, %0, %cst_42 {dimension_numbers = #tpu.dot_dimension_numbers<[1], [0], [0], [1], [0, 0, 1, 1], [], []>} : vector<1x128xf32>, vector<128x8xf32>, vector<1x8xf32> -> vector<1x8xf32>
    %cst_43 = arith.constant dense<0.000000e+00> : vector<1x8xf32>
    %79 = tpu.matmul %77, %0, %cst_43 {dimension_numbers = #tpu.dot_dimension_numbers<[1], [0], [0], [1], [0, 0, 1, 1], [], []>} : vector<1x128xf32>, vector<128x8xf32>, vector<1x8xf32> -> vector<1x8xf32>
    %cst_44 = arith.constant 0.001953125 : f32
    %80 = vector.broadcast %cst_44 : f32 to vector<1x8xf32>
    %81 = arith.mulf %78, %80 : vector<1x8xf32>
    %cst_45 = arith.constant 0.001953125 : f32
    %82 = vector.broadcast %cst_45 : f32 to vector<1x8xf32>
    %83 = arith.mulf %79, %82 : vector<1x8xf32>
    %84 = arith.mulf %81, %81 : vector<1x8xf32>
    %85 = arith.subf %83, %84 : vector<1x8xf32>
    %cst_46 = arith.constant 0.000000e+00 : f32
    %86 = vector.broadcast %cst_46 : f32 to vector<1x8xf32>
    %87 = arith.maximumf %85, %86 : vector<1x8xf32>
    %c0_47 = arith.constant 0 : index
    %c0_48 = arith.constant 0 : index
    %88 = vector.load %arg5[%c0_47, %c0_48] : memref<1x8xf32, #tpu.memory_space<vmem>>, vector<1x8xf32>
    %cst_49 = arith.constant 9.99999974E-6 : f32
    %89 = vector.broadcast %cst_49 : f32 to vector<1x8xf32>
    %90 = arith.addf %87, %89 : vector<1x8xf32>
    %91 = math.rsqrt %90 : vector<1x8xf32>
    %92 = arith.mulf %88, %91 : vector<1x8xf32>
    %c0_50 = arith.constant 0 : index
    %c0_51 = arith.constant 0 : index
    %93 = vector.load %arg6[%c0_50, %c0_51] : memref<1x8xf32, #tpu.memory_space<vmem>>, vector<1x8xf32>
    %94 = arith.mulf %81, %92 : vector<1x8xf32>
    %95 = arith.subf %93, %94 : vector<1x8xf32>
    %96 = tpu.concatenate %92, %92, %92, %92, %92, %92, %92, %92, %92, %92, %92, %92, %92, %92, %92, %92 in 1 : vector<1x8xf32>, vector<1x8xf32>, vector<1x8xf32>, vector<1x8xf32>, vector<1x8xf32>, vector<1x8xf32>, vector<1x8xf32>, vector<1x8xf32>, vector<1x8xf32>, vector<1x8xf32>, vector<1x8xf32>, vector<1x8xf32>, vector<1x8xf32>, vector<1x8xf32>, vector<1x8xf32>, vector<1x8xf32> -> vector<1x128xf32>
    %97 = tpu.concatenate %95, %95, %95, %95, %95, %95, %95, %95, %95, %95, %95, %95, %95, %95, %95, %95 in 1 : vector<1x8xf32>, vector<1x8xf32>, vector<1x8xf32>, vector<1x8xf32>, vector<1x8xf32>, vector<1x8xf32>, vector<1x8xf32>, vector<1x8xf32>, vector<1x8xf32>, vector<1x8xf32>, vector<1x8xf32>, vector<1x8xf32>, vector<1x8xf32>, vector<1x8xf32>, vector<1x8xf32>, vector<1x8xf32> -> vector<1x128xf32>
    %98 = vector.broadcast %96 : vector<1x128xf32> to vector<32x128xf32>
    %99 = arith.mulf %72, %98 : vector<32x128xf32>
    %100 = vector.broadcast %97 : vector<1x128xf32> to vector<32x128xf32>
    %101 = arith.addf %99, %100 : vector<32x128xf32>
    %cst_52 = arith.constant 0.000000e+00 : f32
    %102 = vector.broadcast %cst_52 : f32 to vector<32x128xf32>
    %103 = arith.maximumf %101, %102 : vector<32x128xf32>
    %c0_53 = arith.constant 0 : index
    %c0_54 = arith.constant 0 : index
    %104 = vector.load %arg8[%c0_53, %c0_54] : memref<32x128xf32, #tpu.memory_space<vmem>>, vector<32x128xf32>
    tpu.vector_store %arg8[%c0_53, %c0_54], %103 {strides = array<i32>} : memref<32x128xf32, #tpu.memory_space<vmem>>, vector<32x128xf32>,
    return
  }
}

</mosaic_0001>

<bundles_post_ra>
// kernel: double_conv_forward.1
= control target key start
LH: loop header
LB: loop body
LE: loop exit
PB: predicated region body
PF: predicated region fallthrough
CT: control target
= control target key end

     0   :  { %vm162_vm0 = vcmask 1043456   ;;  %vm155_vm1 = vcmask 588800   ;;  %vm61_vm2 = vsmask.f32 3328  ;;  %vm62_vm3 = vsmask.f32 7440  ;;  %s2909_s1 = inlined_call_operand.vmem [shape: bf16[3,72,128], index: 1, kind: input, shape index: {}]   ;;  %s2910_s0 = inlined_call_operand.vmem [shape: bf16[2,18,72], index: 0, kind: input, shape index: {}]   ;;  %s2911_s7 = inlined_call_operand.vmem [shape: f32[128,8], index: 7, kind: input, shape index: {}]   ;;  %s2912_s2 = inlined_call_operand.vmem [shape: f32[1,8], index: 2, kind: input, shape index: {}]   ;;  %s2913_s3 = inlined_call_operand.vmem [shape: f32[1,8], index: 3, kind: input, shape index: {}]   ;;  %s2914_s4 = inlined_call_operand.vmem [shape: bf16[3,144,128], index: 4, kind: input, shape index: {}]   ;;  %s2915_s5 = inlined_call_operand.vmem [shape: f32[1,8], index: 5, kind: input, shape index: {}]   ;;  %s2916_s6 = inlined_call_operand.vmem [shape: f32[1,8], index: 6, kind: input, shape index: {}]   ;;  %s2917_s8 = inlined_call_operand.vmem [shape: f32[32,128], index: 8, kind: output, shape index: {}]  }
   0x1   :  { %v2150_v0 = vld [vmem:[%s2909_s1] sm:$0xff]   ;;  %v2151_v1 = vld [vmem:[%s2909_s1 + $0x8] sm:$0xff]   ;;  %v2152_v2 = vld [vmem:[%s2909_s1 + $0x10] sm:$0xff]   ;;  %vm312_vm4 = vcmask 1042432   ;;  %vm313_vm5 = vcmask 1046532   ;;  %vm2199_vm8 = vmmov 0  }
   0x2   :  { %1840 = vmatprep.subr.bf16.mxu0 %v2150_v0  ;;  %v2154_v3 = vld [vmem:[%s2909_s1 + $0x20] ss:$0 sps:$4 sm:$0xff]   ;;  %v2155_v4 = vld [vmem:[%s2909_s1 + $0x24] sm:$0xff]   ;;  %v2153_v9 = vld [vmem:[%s2909_s1 + $0x18] sm:$0xff]   ;;  %s2201_s12 = smov 24   ;;  %s2203_s13 = smov 16  }
   0x3   :  { %1841 = vmatpush3.bf16.msra.mxu0 %v2150_v0  ;;  %v46_v5 = vld [vmem:[%s2910_s0] sm:$0xf]  ;;  %v47_v6 = vld [vmem:[%s2910_s0 + $0x4] sm:$0xf]  ;;  %1826 = vmatprep.subr.bf16.mxu1 %v2155_v4  ;;  %v259_v11 = vsel %vm162_vm0, %v2154_v3, 0  ;;  %v2158_v13 = vld [vmem:[%s2909_s1 + $0x2c] sm:$0xff]  }
   0x4   :  { %1842 = vmatprep.subr.bf16.mxu0 %v2151_v1  ;;  %v65_v7 = vshrl.u32 %v46_v5, 16  ;;  %v1639_v8 = vcombine.low %v46_v5, %v47_v6  ;;  %1827 = vmatpush3.bf16.msra.mxu1 %v2155_v4  ;;  %v68_v10 = vshll.u32 %v46_v5, 16  ;;  %v1648_v12 = vrot.slane %v46_v5, 9  ;;  %v2294_v15 = vld [vmem:[%s2910_s0 + $0xc] sm:$0xf]  ;;  %v2161_v20 = vld [vmem:[%s2909_s1 + $0x34] sm:$0xff]   ;;  %vm2308_vm6 = vmor %vm312_vm4, %vm313_vm5 }
   0x5   :  { %v78_v14 = vshrl.u32 %v47_v6, 16  ;;  %v317_v17 = vrot.slane %v47_v6, 5  ;;  %1828 = vmatprep.subr.bf16.mxu1 %v2158_v13  ;;  %v89_v18 = vshrl.u32 %v2294_v15, 16  ;;  %v2300_v19 = vld [vmem:[%s2910_s0 + $0x10] sm:$0xf]  ;;  %v92_v22 = vshll.u32 %v2294_v15, 16  ;;  %vm2318_vm7 = vmor %vm61_vm2, %vm62_vm3 }
   0x6   :  { %1850 = vmatprep.mubr.msk.bf16.mxu0 %vm155_vm1, %v1639_v8  ;;  %v67_v16 = vrot.slane %v65_v7, 4  ;;  %v70_v21 = vrot.slane %v68_v10, 5  ;;  %v74_v23 = vshll.u32 %v47_v6, 16  ;;  %v2163_v25 = vld [vmem:[%s2909_s1 + $0x3c] sm:$0xff]   ;;  %v102_v28 = vshrl.u32 %v2300_v19, 16  ;;  %v2157_v32 = vld [vmem:[%s2909_s1 + $0x48] sm:$0xff]  }
   0x7   :  { %1843 = vmatpush3.bf16.msra.mxu0 %v2151_v1  ;;  %v80_v27 = vrot.slane %v78_v14, 4  ;;  %v319_v31 = vrot.slane %v317_v17, 4  ;;  %v48_v33 = vld [vmem:[%s2910_s0 + $0x8] sm:$0x1]  ;;  %v91_v35 = vrot.slane %v89_v18, 4  ;;  %v318_v40 = vsel %vm2308_vm6, %v1648_v12, %v317_v17  ;;  %v2160_v50 = vld [vmem:[%s2909_s1 + $0x50] sm:$0xff]  }
   0x8   :  { %1844 = vmatprep.subr.bf16.mxu0 %v2152_v2  ;;  %1829 = vmatpush3.bf16.msra.mxu1 %v2158_v13  ;;  %v71_v26 = vor.u32 %v70_v21, %v67_v16  ;;  %v76_v30 = vrot.slane %v74_v23, 5  ;;  %v2165_v36 = vld [vmem:[%s2909_s1 + $0x44] ss:$0 sps:$4 sm:$0xff]   ;;  %v84_v38 = vshll.u32 %v48_v33, 16  ;;  %v320_v39 = vrot.slane %v48_v33, 5  ;;  %v31_v62 = vld [vmem:[%s2911_s7 + $0x8] sm:$0xff] }
   0x9   :  { %1830 = vmatprep.subr.bf16.mxu1 %v2161_v20  ;;  %v1640_v41 = vcombine.low %v2294_v15, %v2300_v19  ;;  %v51_v43 = vld [vmem:[%s2910_s0 + $0x14] sm:$0x1]  ;;  %v94_v44 = vrot.slane %v92_v22, 5  ;;  %v98_v45 = vshll.u32 %v2300_v19, 16  ;;  %v104_v48 = vrot.slane %v102_v28, 4  ;;  %v30_v61 = vld [vmem:[%s2911_s7] sm:$0xff] }
   0xa   :  { %v72_v34 = vrot.slane %v71_v26, 4  ;;  %v81_v37 = vor.u32 %v80_v27, %v76_v30  ;;  %v86_v47 = vrot.slane %v84_v38, 5  ;;  %v108_v49 = vshll.u32 %v51_v43, 16  ;;  %v2162_v63 = vld [vmem:[%s2909_s1 + $0x58] sm:$0xff]   ;;  %v32_v7 = vld [vmem:[%s2911_s7 + $0x10] sm:$0xff]  ;;  %v39_v26 = vld [vmem:[%s2911_s7 + $0x48] sm:$0xff] }
   0xb   :  { %1845 = vmatpush3.bf16.msra.mxu0 %v2152_v2  ;;  %v95_v51 = vor.u32 %v94_v44, %v91_v35  ;;  %v100_v52 = vrot.slane %v98_v45, 5  ;;  %v164_v53 = vsel %vm162_vm0, %v2165_v36, 0  ;;  %v321_v56 = vsel %vm2308_vm6, %v319_v31, %v320_v39  ;;  %v33_v8 = vld [vmem:[%s2911_s7 + $0x18] sm:$0xff]  ;;  %v2166_v14 = vld [vmem:[%s2909_s1 + $0x68] ss:$0 sps:$4 sm:$0xff]   ;;  %v36_v22 = vld [vmem:[%s2911_s7 + $0x30] sm:$0xff] }
   0xc   :  { %1846 = vmatprep.subr.bf16.mxu0 %v2153_v9  ;;  %1831 = vmatpush3.bf16.msra.mxu1 %v2161_v20  ;;  %v77_v42 = vsel %vm2318_vm7, %v72_v34, %v76_v30  ;;  %v82_v46 = vrot.slane %v81_v37, 4  ;;  %v110_v55 = vrot.slane %v108_v49, 5  ;;  %v1659_v60 = vcombine.low %v318_v40, %v321_v56  ;;  %v35_v20 = vld [vmem:[%s2911_s7 + $0x28] sm:$0xff]  ;;  %v37_v23 = vld [vmem:[%s2911_s7 + $0x38] sm:$0xff]  ;;  %v40_v28 = vld [vmem:[%s2911_s7 + $0x50] sm:$0xff]  ;;  %s2205_s14 = smov 40  }
   0xd   :  { %1832 = vmatprep.subr.bf16.mxu1 %v2163_v25  ;;  %v96_v58 = vrot.slane %v95_v51, 4  ;;  %v105_v59 = vor.u32 %v104_v48, %v100_v52  ;;  %v2368_v4 = vpack.c.bf16 %v31_v62, %v30_v61  ;;  %v324_v5 = vrot.slane %v2300_v19, 5  ;;  %v34_v19 = vld [vmem:[%s2911_s7 + $0x20] sm:$0xff]  ;;  %v41_v29 = vld [vmem:[%s2911_s7 + $0x58] sm:$0xff]  ;;  %v44_v34 = vld [vmem:[%s2911_s7 + $0x70] sm:$0xff]  ;;  %s2206_s15 = smov 48  }
   0xe   :  { %v87_v54 = vsel %vm2318_vm7, %v82_v46, %v86_v47  ;;  %v2382_v10 = vpack.c.bf16 %v33_v8, %v32_v7  ;;  %v327_v12 = vrot.slane %v51_v43, 5  ;;  %v2404_v21 = vpack.c.bf16 %v35_v20, %v34_v19  ;;  %v42_v31 = vld [vmem:[%s2911_s7 + $0x60] sm:$0xff]  ;;  %v45_v35 = vld [vmem:[%s2911_s7 + $0x78] sm:$0xff]  ;;  %s2207_s16 = smov 56   ;;  %s2208_s17 = smov 64  }
   0xf   :  { %1847 = vmatpush3.bf16.msra.mxu0 %v2153_v9  ;;  %v1630_v57 = vcombine.low %v77_v42, %v87_v54  ;;  %v101_v0 = vsel %vm2318_vm7, %v96_v58, %v100_v52  ;;  %v106_v1 = vrot.slane %v105_v59, 4  ;;  %v2164_v9 = vld [vmem:[%s2909_s1 + $0x60] sm:$0xff]   ;;  %v326_v13 = vrot.slane %v324_v5, 4  ;;  %s2209_s18 = smov 72   ;;  %s2210_s0 = smov 80  }
  0x10   :  { %2129 = vmatprep.subr.msk.bf16.mxu0 %vm162_vm0, %v2154_v3  ;;  %1833 = vmatpush3.bf16.msra.mxu1 %v2163_v25  ;;  %v2198_v3 = vmov 0.0|0.0   ;;  %v2414_v24 = vpack.c.bf16 %v37_v23, %v36_v22  ;;  %v38_v25 = vld [vmem:[%s2911_s7 + $0x40] sm:$0xff]  ;;  %v2434_v30 = vpack.c.bf16 %v41_v29, %v40_v28  ;;  %v2455_v37 = vpack.c.bf16 %v45_v35, %v44_v34  ;;  %s2211_s19 = smov 88   ;;  %s2212_s20 = smov 96  }
  0x11   :  { %2128 = vmatprep.subr.msk.bf16.mxu1 %vm162_vm0, %v2165_v36  ;;  %1836 = vmatprep.mubr.msk.bf16.mxu1 %vm155_vm1, %v1630_v57  ;;  %v111_v2 = vsel %vm2318_vm7, %v106_v1, %v110_v55  ;;  %v328_v17 = vsel %vm2308_vm6, %v326_v13, %v327_v12  ;;  %v2424_v27 = vpack.c.bf16 %v39_v26, %v38_v25  ;;  %v2200_v36 = vmov 0.0   ;;  %v601_v25 = vld [vmem:[%s2912_s2] sm:$0x1]  ;;  %s2202_s2 = smov 8   ;;  %s2213_s21 = smov 104  }
  0x12   :  { %v1631_v6 = vcombine.low %v101_v0, %v111_v2  ;;  %v609_v22 = vlaneseq  ;;  %s2214_s22 = smov 112   ;;  %s2215_s23 = smov 120   ;;  %vm658_vm9 = vcmask 64512   ;;  %vm660_vm10 = vcmask 130048  }
  0x13   :  { %1849 = vmatpush3.bf16.msra.mxu0 %v259_v11  ;;  %v1649_v11 = vrot.slane %v2294_v15, 9  ;;  %v379_v15 = vsel %vm162_vm0, %v2166_v14, 0  ;;  %vm662_vm11 = vcmask 195584   ;;  %vm664_vm12 = vcmask 261120  }
  0x14   :  { %1854 = vmatprep.subr.bf16.mxu0 %v2157_v32  ;;  %1835 = vmatpush3.bf16.msra.mxu1 %v164_v53  ;;  %v610_v23 = vshrl.u32 %v609_v22, 7  ;;  %vm666_vm13 = vcmask 326656   ;;  %vm668_vm14 = vcmask 392192   ;;  %vm670_vm15 = vcmask 457728  }
  0x15   :  { %2008 = vmatprep.subr.bf16.mxu1 %v2198_v3  ;;  %v325_v16 = vsel %vm2308_vm6, %v1649_v11, %v324_v5  ;;  %vm675_vm2 = vcmask 654336   ;;  %vm677_vm3 = vcmask 719872   ;;  %vm2921_vm4 = vcmask 785408  }
  0x16   :  { %1851 = vmatmul.mubr.msk.bf16.vlgmr.msra.gmra.mrb[0].mxu0 %vm155_vm1, %v1640_v41  ;;  %v1660_v18 = vcombine.low %v325_v16, %v328_v17  ;;  %v2519_v26 = vsub.s32 0, %v610_v23  ;;  %vm2920_vm5 = vcmask 850944   ;;  %vm2919_vm6 = vcmask 916480  }
  0x17   :  { %1855 = vmatpush3.bf16.msra.mxu0 %v2157_v32  ;;  %1864 = vmatprep.mubr.msk.bf16.mxu0 %vm155_vm1, %v1659_v60  ;;  %v43_v32 = vld [vmem:[%s2911_s7 + $0x68] sm:$0xff]  ;;  %vm2918_vm7 = vcmask 982016  }
  0x18   :  { %1856 = vmatprep.subr.bf16.mxu0 %v2160_v50  ;;  %1837 = vmatmul.mubr.msk.bf16.vlgmr.msra.gmra.mrb[0].mxu1 %vm155_vm1, %v1631_v6  ;;  %v2444_v33 = vpack.c.bf16 %v43_v32, %v42_v31  ;;  %v605_v31 = vld [vmem:[%s2913_s3] sm:$0x1]  ;;  %s2204_s3 = smov 32  }
  0x19   :  { %2010 = vmatpush3.bf16.msra.mxu1 %v2368_v4  ;;  %1900 = vmatprep.mubr.msk.f32.mxu1 %vm2199_vm8, %v2200_v36 }
  0x1a   :  { %2011 = vmatprep.subr.bf16.mxu1 %v2198_v3 }
  0x1b   :  { %1857 = vmatpush3.bf16.msra.mxu0 %v2160_v50 }
  0x1c   :  { %1858 = vmatprep.subr.bf16.mxu0 %v2162_v63 }
  0x1d   :  { %2013 = vmatpush3.bf16.msra.mxu1 %v2382_v10 }
  0x1e   :  { %2014 = vmatprep.subr.bf16.mxu1 %v2198_v3 }
  0x1f   :  { %1859 = vmatpush3.bf16.msra.mxu0 %v2162_v63 }
  0x20   :  { %1860 = vmatprep.subr.bf16.mxu0 %v2164_v9 }
  0x21   :  { %2016 = vmatpush3.bf16.msra.mxu1 %v2404_v21 }
  0x22   :  { %2017 = vmatprep.subr.bf16.mxu1 %v2198_v3 }
  0x23   :  { %1861 = vmatpush3.bf16.msra.mxu0 %v2164_v9 }
  0x24   :  { %2130 = vmatprep.subr.msk.bf16.mxu0 %vm162_vm0, %v2166_v14  ;;  %vm672_vm0 = vcmask 523264  }
  0x25   :  { %2019 = vmatpush3.bf16.msra.mxu1 %v2414_v24 }
  0x26   :  { %2020 = vmatprep.subr.bf16.mxu1 %v2198_v3 }
  0x27   :  { %1863 = vmatpush3.bf16.msra.mxu0 %v379_v15 }
  0x29   :  { %2022 = vmatpush3.bf16.msra.mxu1 %v2424_v27 }
  0x2a   :  { %1865 = vmatmul.mubr.msk.bf16.vlgmr.msra.gmra.mrb[0].mxu0 %vm155_vm1, %v1660_v18  ;;  %2023 = vmatprep.subr.bf16.mxu1 %v2198_v3 }
  0x2d   :  { %2025 = vmatpush3.bf16.msra.mxu1 %v2434_v30 }
  0x2e   :  { %2026 = vmatprep.subr.bf16.mxu1 %v2198_v3 }
  0x31   :  { %2028 = vmatpush3.bf16.msra.mxu1 %v2444_v33 }
  0x32   :  { %2029 = vmatprep.subr.bf16.mxu1 %v2198_v3 }
  0x35   :  { %2031 = vmatpush3.bf16.msra.mxu1 %v2455_v37 }
  0x36   :  { %2032 = vmatprep.subr.bf16.mxu1 %v2198_v3 }
  0xeb   :  { %v1838_v38 = vpop.f32.mrb[0].mxu1 }
  0xec   :  { %v200_v39 = vpop.f32.mrb[1].mxu1 }
  0xed   :  { %v1839_v40 = vpop.f32.mrb[2].mxu1 }
  0xee   :  { %v203_v41 = vpop.f32.mrb[3].mxu1 }
  0xfd   :  { %v1866_v42 = vpop.f32.mrb[0].mxu0 }
  0xfe   :  { %v2460_v43 = vadd.f32 %v1866_v42, %v1838_v38  ;;  %v415_v44 = vpop.f32.mrb[1].mxu0  ;;  %v2169_v42 = vld [vmem:[%s2914_s4 + $0x58] sm:$0xff]  }
  0xff   :  { %v2462_v45 = vadd.f32 %v415_v44, %v200_v39  ;;  %v1867_v46 = vpop.f32.mrb[2].mxu0  ;;  %v2216_v39 = vmov 0   ;;  %v2170_v44 = vld [vmem:[%s2914_s4 + $0x60] sm:$0xff]  }
 0x100   :  { %v2464_v47 = vadd.f32 %v1867_v46, %v1839_v40  ;;  %v418_v48 = vpop.f32.mrb[3].mxu0  ;;  %v445_v62 = vmul.f32 %v2460_v43, %v2460_v43  ;;  %978 = vmatprep.subr.bf16.mxu0 %v2216_v39  ;;  %v2167_v40 = vld [vmem:[%s2914_s4 + $0x48] sm:$0xff]  }
 0x101   :  { %v2466_v49 = vadd.f32 %v418_v48, %v203_v41  ;;  %v443_v58 = vmul.f32 %v2462_v45, %v2462_v45  ;;  %979 = vmatpush1.bf16.msra.mxu0 %v2167_v40  ;;  %v2168_v41 = vld [vmem:[%s2914_s4 + $0x50] sm:$0xff]   ;;  %v2171_v46 = vld [vmem:[%s2914_s4 + $0x68] sm:$0xff]  }
 0x102   :  { %v446_v0 = vmul.f32 %v2464_v47, %v2464_v47  ;;  %980 = vmatprep.subr.bf16.mxu0 %v2216_v39 }
 0x103   :  { %v434_v50 = vadd.f32 %v2466_v49, %v2462_v45  ;;  %v444_v56 = vmul.f32 %v2466_v49, %v2466_v49 }
 0x105   :  { %v435_v51 = vadd.f32 %v2460_v43, %v434_v50  ;;  %v447_v60 = vadd.f32 %v444_v56, %v443_v58  ;;  %981 = vmatpush1.bf16.msra.mxu0 %v2168_v41 }
 0x106   :  { %982 = vmatprep.subr.bf16.mxu0 %v2216_v39 }
 0x107   :  { %v436_v52 = vadd.f32 %v2464_v47, %v435_v51  ;;  %v448_v63 = vadd.f32 %v447_v60, %v445_v62 }
 0x109   :  { %v437_v53 = vrot.slane %v436_v52, 4  ;;  %v449_v1 = vadd.f32 %v448_v63, %v446_v0  ;;  %983 = vmatpush1.bf16.msra.mxu0 %v2169_v42 }
 0x10a   :  { %984 = vmatprep.subr.bf16.mxu0 %v2216_v39 }
 0x10b   :  { %v438_v54 = vadd.f32 %v437_v53, %v436_v52  ;;  %v450_v2 = vrot.slane %v449_v1, 4 }
 0x10d   :  { %v439_v55 = vrot.slane %v438_v54, 2  ;;  %v451_v5 = vadd.f32 %v450_v2, %v449_v1  ;;  %985 = vmatpush1.bf16.msra.mxu0 %v2170_v44 }
 0x10e   :  { %986 = vmatprep.subr.bf16.mxu0 %v2216_v39 }
 0x10f   :  { %v440_v57 = vadd.f32 %v439_v55, %v438_v54  ;;  %v452_v6 = vrot.slane %v451_v5, 2 }
 0x111   :  { %v441_v59 = vrot.slane %v440_v57, 1  ;;  %v453_v7 = vadd.f32 %v452_v6, %v451_v5  ;;  %987 = vmatpush1.bf16.msra.mxu0 %v2171_v46 }
 0x112   :  { %988 = vmatprep.subr.bf16.mxu0 %v2216_v39 }
 0x113   :  { %v442_v61 = vadd.f32 %v441_v59, %v440_v57  ;;  %v454_v8 = vrot.slane %v453_v7, 1 }
 0x115   :  { %1901 = vmatmul.mubr.f32.vlgmr.msra.gmra.mrb[4].mxu1 %v442_v61  ;;  %v455_v9 = vadd.f32 %v454_v8, %v453_v7 }
 0x116   :  { %2034 = vmatpush3.bf16.msra.mxu1 %v2368_v4  ;;  %1935 = vmatprep.mubr.msk.f32.mxu1 %vm2199_vm8, %v2200_v36 }
 0x117   :  { %2035 = vmatprep.subr.bf16.mxu1 %v2198_v3 }
 0x11a   :  { %2037 = vmatpush3.bf16.msra.mxu1 %v2382_v10 }
 0x11b   :  { %2038 = vmatprep.subr.bf16.mxu1 %v2198_v3 }
 0x11e   :  { %2040 = vmatpush3.bf16.msra.mxu1 %v2404_v21 }
 0x11f   :  { %2041 = vmatprep.subr.bf16.mxu1 %v2198_v3 }
 0x122   :  { %2043 = vmatpush3.bf16.msra.mxu1 %v2414_v24 }
 0x123   :  { %2044 = vmatprep.subr.bf16.mxu1 %v2198_v3 }
 0x126   :  { %2046 = vmatpush3.bf16.msra.mxu1 %v2424_v27 }
 0x127   :  { %2047 = vmatprep.subr.bf16.mxu1 %v2198_v3 }
 0x12a   :  { %2049 = vmatpush3.bf16.msra.mxu1 %v2434_v30 }
 0x12b   :  { %2050 = vmatprep.subr.bf16.mxu1 %v2198_v3 }
 0x12e   :  { %2052 = vmatpush3.bf16.msra.mxu1 %v2444_v33 }
 0x12f   :  { %2053 = vmatprep.subr.bf16.mxu1 %v2198_v3 }
 0x132   :  { %2055 = vmatpush3.bf16.msra.mxu1 %v2455_v37 }
 0x133   :  { %2056 = vmatprep.subr.bf16.mxu1 %v2198_v3 }
 0x135   :  { %1936 = vmatmul.mubr.f32.vlgmr.msra.gmra.mrb[6].mxu1 %v455_v9 }
 0x136   :  { %2058 = vmatpush3.bf16.msra.mxu1 %v2368_v4  ;;  %1970 = vmatprep.mubr.msk.f32.mxu1 %vm2199_vm8, %v2200_v36 }
 0x137   :  { %2059 = vmatprep.subr.bf16.mxu1 %v2198_v3 }
 0x13a   :  { %2061 = vmatpush3.bf16.msra.mxu1 %v2382_v10 }
 0x13b   :  { %2062 = vmatprep.subr.bf16.mxu1 %v2198_v3 }
 0x13e   :  { %2064 = vmatpush3.bf16.msra.mxu1 %v2404_v21 }
 0x13f   :  { %2065 = vmatprep.subr.bf16.mxu1 %v2198_v3 }
 0x142   :  { %2067 = vmatpush3.bf16.msra.mxu1 %v2414_v24 }
 0x143   :  { %2068 = vmatprep.subr.bf16.mxu1 %v2198_v3 }
 0x146   :  { %2070 = vmatpush3.bf16.msra.mxu1 %v2424_v27 }
 0x147   :  { %2071 = vmatprep.subr.bf16.mxu1 %v2198_v3 }
 0x14a   :  { %2073 = vmatpush3.bf16.msra.mxu1 %v2434_v30 }
 0x14b   :  { %2074 = vmatprep.subr.bf16.mxu1 %v2198_v3 }
 0x14e   :  { %2076 = vmatpush3.bf16.msra.mxu1 %v2444_v33 }
 0x14f   :  { %2077 = vmatprep.subr.bf16.mxu1 %v2198_v3 }
 0x152   :  { %2079 = vmatpush3.bf16.msra.mxu1 %v2455_v37 }
 0x153   :  { %2080 = vmatprep.subr.bf16.mxu1 %v2198_v3 }
 0x1e8   :  { %v522_v11 = vpop.f32.mrb[4].mxu1 }
 0x1e9   :  { %v1902_v12 = vpop.f32.mrb[5].mxu1  ;;  %v596_v13 = vmul.f32 0.001953125, %v522_v11 }
 0x1eb   :  { %v598_v16 = vmul.f32 %v596_v13, %v596_v13 }
 0x208   :  { %v592_v14 = vpop.f32.mrb[6].mxu1 }
 0x209   :  { %v597_v17 = vmul.f32 0.001953125, %v592_v14  ;;  %v1937_v15 = vpop.f32.mrb[7].mxu1 }
 0x20b   :  { %v599_v18 = vsub.f32 %v597_v17, %v598_v16 }
 0x20d   :  { %v600_v19 = vmax.f32 %v599_v18, 0.0 }
 0x20f   :  { %v602_v20 = vadd.f32 1e-05, %v600_v19 }
 0x211   :  { %2194 = vrsqrt.f32 %v602_v20 }
 0x21b   :  { %v2195_v28 = vpop.eup %2194 }
 0x21c   :  { %v2521_v29 = vmul.f32 %v2195_v28, %v601_v25 }
 0x21e   :  { %v606_v32 = vmul.f32 %v2521_v29, %v596_v13  ;;  %v612_v34 = vrot.slane %v2521_v29, %v2519_v26 }
 0x220   :  { %v2529_v35 = vsub.f32 %v605_v31, %v606_v32  ;;  %619 = vrot.lane.b32.xlu1 %v612_v34, %s2201_s12  ;;  %613 = vrot.lane.b32.xlu0 %v612_v34, %s2202_s2 }
 0x222   :  { %v691_v38 = vrot.slane %v2529_v35, %v2519_v26 }
 0x224   :  { %616 = vrot.lane.b32.xlu0 %v612_v34, %s2203_s13  ;;  %692 = vrot.lane.b32.xlu1 %v691_v38, %s2202_s2 }
 0x228   :  { %622 = vrot.lane.b32.xlu0 %v612_v34, %s2204_s3  ;;  %695 = vrot.lane.b32.xlu1 %v691_v38, %s2203_s13 }
 0x22c   :  { %625 = vrot.lane.b32.xlu0 %v612_v34, %s2205_s14  ;;  %698 = vrot.lane.b32.xlu1 %v691_v38, %s2201_s12 }
 0x230   :  { %628 = vrot.lane.b32.xlu0 %v612_v34, %s2206_s15  ;;  %701 = vrot.lane.b32.xlu1 %v691_v38, %s2204_s3 }
 0x234   :  { %631 = vrot.lane.b32.xlu0 %v612_v34, %s2207_s16  ;;  %704 = vrot.lane.b32.xlu1 %v691_v38, %s2205_s14 }
 0x238   :  { %634 = vrot.lane.b32.xlu0 %v612_v34, %s2208_s17  ;;  %707 = vrot.lane.b32.xlu1 %v691_v38, %s2206_s15 }
 0x23c   :  { %637 = vrot.lane.b32.xlu0 %v612_v34, %s2209_s18  ;;  %710 = vrot.lane.b32.xlu1 %v691_v38, %s2207_s16 }
 0x240   :  { %640 = vrot.lane.b32.xlu0 %v612_v34, %s2210_s0  ;;  %713 = vrot.lane.b32.xlu1 %v691_v38, %s2208_s17 }
 0x244   :  { %643 = vrot.lane.b32.xlu0 %v612_v34, %s2211_s19  ;;  %716 = vrot.lane.b32.xlu1 %v691_v38, %s2209_s18 }
 0x248   :  { %646 = vrot.lane.b32.xlu0 %v612_v34, %s2212_s20  ;;  %719 = vrot.lane.b32.xlu1 %v691_v38, %s2210_s0 }
 0x24c   :  { %649 = vrot.lane.b32.xlu0 %v612_v34, %s2213_s21  ;;  %722 = vrot.lane.b32.xlu1 %v691_v38, %s2211_s19 }
 0x250   :  { %652 = vrot.lane.b32.xlu0 %v612_v34, %s2214_s22  ;;  %725 = vrot.lane.b32.xlu1 %v691_v38, %s2212_s20 }
 0x254   :  { %655 = vrot.lane.b32.xlu0 %v612_v34, %s2215_s23  ;;  %728 = vrot.lane.b32.xlu1 %v691_v38, %s2213_s21 }
 0x258   :  { %731 = vrot.lane.b32.xlu0 %v691_v38, %s2214_s22  ;;  %734 = vrot.lane.b32.xlu1 %v691_v38, %s2215_s23 }
 0x292   :  { %v620_v48 = vpop.permute.xlu1 %619  ;;  %v614_v50 = vpop.permute.xlu0 %613 }
 0x293   :  { %v659_v7 = vsel %vm658_vm9, %v2521_v29, %v614_v50 }
 0x296   :  { %v617_v51 = vpop.permute.xlu0 %616  ;;  %v693_v52 = vpop.permute.xlu1 %692 }
 0x297   :  { %v661_v8 = vsel %vm660_vm10, %v659_v7, %v617_v51  ;;  %v737_v16 = vsel %vm658_vm9, %v2529_v35, %v693_v52 }
 0x298   :  { %v663_v12 = vsel %vm662_vm11, %v661_v8, %v620_v48 }
 0x29a   :  { %v623_v53 = vpop.permute.xlu0 %622  ;;  %v696_v54 = vpop.permute.xlu1 %695 }
 0x29b   :  { %v665_v13 = vsel %vm664_vm12, %v663_v12, %v623_v53  ;;  %v738_v19 = vsel %vm660_vm10, %v737_v16, %v696_v54  ;;  %v2175_v16 = vld [vmem:[%s2914_s4 + $0x88] sm:$0xff]  }
 0x29e   :  { %v626_v55 = vpop.permute.xlu0 %625  ;;  %v699_v56 = vpop.permute.xlu1 %698 }
 0x29f   :  { %v667_v14 = vsel %vm666_vm13, %v665_v13, %v626_v55  ;;  %v739_v22 = vsel %vm662_vm11, %v738_v19, %v699_v56 }
 0x2a2   :  { %v629_v57 = vpop.permute.xlu0 %628  ;;  %v702_v58 = vpop.permute.xlu1 %701 }
 0x2a3   :  { %v669_v17 = vsel %vm668_vm14, %v667_v14, %v629_v57  ;;  %v740_v25 = vsel %vm664_vm12, %v739_v22, %v702_v58  ;;  %v2172_v57 = vld [vmem:[%s2914_s4 + $0x70] sm:$0xff]  }
 0x2a4   :  { %989 = vmatpush1.bf16.msra.mxu0 %v2172_v57 }
 0x2a5   :  { %990 = vmatprep.subr.bf16.mxu0 %v2216_v39 }
 0x2a6   :  { %v632_v59 = vpop.permute.xlu0 %631  ;;  %v705_v60 = vpop.permute.xlu1 %704 }
 0x2a7   :  { %v671_v20 = vsel %vm670_vm15, %v669_v17, %v632_v59  ;;  %v741_v29 = vsel %vm666_vm13, %v740_v25, %v705_v60 }
 0x2aa   :  { %v635_v61 = vpop.permute.xlu0 %634  ;;  %v708_v62 = vpop.permute.xlu1 %707 }
 0x2ab   :  { %v673_v23 = vsel %vm672_vm0, %v671_v20, %v635_v61  ;;  %v742_v35 = vsel %vm668_vm14, %v741_v29, %v708_v62 }
 0x2ae   :  { %v638_v63 = vpop.permute.xlu0 %637  ;;  %v711_v0 = vpop.permute.xlu1 %710 }
 0x2af   :  { %v674_v28 = vsel %vm155_vm1, %v673_v23, %v638_v63  ;;  %v743_v40 = vsel %vm670_vm15, %v742_v35, %v711_v0 }
 0x2b2   :  { %v641_v1 = vpop.permute.xlu0 %640  ;;  %v714_v2 = vpop.permute.xlu1 %713 }
 0x2b3   :  { %v676_v31 = vsel %vm675_vm2, %v674_v28, %v641_v1  ;;  %v744_v42 = vsel %vm672_vm0, %v743_v40, %v714_v2 }
 0x2b6   :  { %v644_v5 = vpop.permute.xlu0 %643  ;;  %v717_v6 = vpop.permute.xlu1 %716 }
 0x2b7   :  { %v678_v38 = vsel %vm677_vm3, %v676_v31, %v644_v5  ;;  %v745_v46 = vsel %vm155_vm1, %v744_v42, %v717_v6  ;;  %v2173_v6 = vld [vmem:[%s2914_s4 + $0x78] sm:$0xff]  }
 0x2b8   :  { %991 = vmatpush1.bf16.msra.mxu0 %v2173_v6 }
 0x2b9   :  { %992 = vmatprep.subr.bf16.mxu0 %v2216_v39 }
 0x2ba   :  { %v647_v9 = vpop.permute.xlu0 %646  ;;  %v720_v11 = vpop.permute.xlu1 %719 }
 0x2bb   :  { %v680_v41 = vsel %vm2921_vm4, %v678_v38, %v647_v9  ;;  %v746_v52 = vsel %vm675_vm2, %v745_v46, %v720_v11 }
 0x2be   :  { %v650_v15 = vpop.permute.xlu0 %649  ;;  %v723_v18 = vpop.permute.xlu1 %722 }
 0x2bf   :  { %v682_v44 = vsel %vm2920_vm5, %v680_v41, %v650_v15  ;;  %v747_v54 = vsel %vm677_vm3, %v746_v52, %v723_v18 }
 0x2c2   :  { %v653_v32 = vpop.permute.xlu0 %652  ;;  %v726_v34 = vpop.permute.xlu1 %725 }
 0x2c3   :  { %v684_v48 = vsel %vm2919_vm6, %v682_v44, %v653_v32  ;;  %v748_v56 = vsel %vm2921_vm4, %v747_v54, %v726_v34  ;;  %vm848_vm4 = vsmask.f32 7424 }
 0x2c6   :  { %v656_v50 = vpop.permute.xlu0 %655  ;;  %v729_v51 = vpop.permute.xlu1 %728 }
 0x2c7   :  { %v686_v53 = vsel %vm2918_vm7, %v684_v48, %v656_v50  ;;  %v749_v58 = vsel %vm2920_vm5, %v748_v56, %v729_v51 }
 0x2c8   :  { %v755_v55 = vrot.slane %v686_v53, %v2519_v26 }
 0x2ca   :  { %v732_v59 = vpop.permute.xlu0 %731  ;;  %v735_v60 = vpop.permute.xlu1 %734  ;;  %v758_v63 = vmul.f32 %v2460_v43, %v755_v55  ;;  %v759_v1 = vmul.f32 %v2464_v47, %v755_v55  ;;  %v756_v2 = vmul.f32 %v2462_v45, %v755_v55  ;;  %v757_v5 = vmul.f32 %v2466_v49, %v755_v55  ;;  %v2174_v45 = vld [vmem:[%s2914_s4 + $0x80] sm:$0xff]  }
 0x2cb   :  { %v750_v61 = vsel %vm2919_vm6, %v749_v58, %v732_v59  ;;  %993 = vmatpush1.bf16.msra.mxu0 %v2174_v45  ;;  %vm820_vm6 = vsmask.f32 256 }
 0x2cc   :  { %v751_v62 = vsel %vm2918_vm7, %v750_v61, %v735_v60  ;;  %994 = vmatprep.subr.bf16.mxu0 %v2216_v39  ;;  %vm819_vm7 = vcmask 1040384  }
 0x2cd   :  { %v763_v0 = vrot.slane %v751_v62, %v2519_v26  ;;  %vm2644_vm5 = vmand %vm819_vm7, %vm820_vm6  ;;  %vm1142_vm6 = vcmask 1046528  }
 0x2cf   :  { %v766_v7 = vadd.f32 %v763_v0, %v758_v63  ;;  %v767_v8 = vadd.f32 %v763_v0, %v759_v1  ;;  %v764_v9 = vadd.f32 %v763_v0, %v756_v2  ;;  %v765_v11 = vadd.f32 %v763_v0, %v757_v5  ;;  %995 = vmatpush1.bf16.msra.mxu0 %v2175_v16 }
 0x2d0   :  { %1085 = vmatprep.subr.bf16.mxu0 %v2216_v39 }
 0x2d1   :  { %v770_v43 = vmax.f32 %v766_v7, 0.0  ;;  %v771_v12 = vmax.f32 %v767_v8, 0.0  ;;  %v768_v13 = vmax.f32 %v764_v9, 0.0  ;;  %v769_v14 = vmax.f32 %v765_v11, 0.0 }
 0x2d3   :  { %v773_v47 = vpack.c.bf16 %v771_v12, %v770_v43  ;;  %v772_v49 = vpack.c.bf16 %v769_v14, %v768_v13 }
 0x2d5   :  { %778 = vrot.lane.b32.xlu1 %v773_v47, %s2202_s2  ;;  %776 = vrot.lane.b32.xlu0 %v772_v49, %s2202_s2 }
 0x347   :  { %v779_v17 = vpop.permute.xlu1 %778  ;;  %v777_v15 = vpop.permute.xlu0 %776 }
 0x348   :  { %v784_v18 = vsel %vm658_vm9, 0, %v779_v17  ;;  %v786_v19 = vsel %vm658_vm9, %v779_v17, 0  ;;  %v782_v20 = vsel %vm658_vm9, 0, %v777_v15  ;;  %v785_v22 = vsel %vm658_vm9, %v777_v15, 0  ;;  %v2176_v15 = vld [vmem:[%s2914_s4] sm:$0xff]  }
 0x349   :  { %v799_v23 = vshrl.u32 %v784_v18, 16  ;;  %v805_v25 = vshrl.u32 %v786_v19, 16  ;;  %v787_v28 = vshrl.u32 %v782_v20, 16  ;;  %v793_v29 = vshrl.u32 %v785_v22, 16 }
 0x34a   :  { %v808_v35 = vshll.u32 %v786_v19, 16  ;;  %v802_v38 = vshll.u32 %v784_v18, 16  ;;  %v790_v41 = vshll.u32 %v782_v20, 16  ;;  %v796_v46 = vshll.u32 %v785_v22, 16 }
 0x34b   :  { %v801_v32 = vrot.slane %v799_v23, 7  ;;  %v807_v34 = vrot.slane %v805_v25, 7  ;;  %v789_v40 = vrot.slane %v787_v28, 7  ;;  %v795_v42 = vrot.slane %v793_v29, 7 }
 0x34d   :  { %v810_v44 = vor.u32 %v808_v35, %v807_v34  ;;  %v804_v48 = vor.u32 %v802_v38, %v801_v32  ;;  %v829_v50 = vsel %vm2644_vm5, %v807_v34, 0  ;;  %v792_v51 = vor.u32 %v790_v41, %v789_v40  ;;  %v2177_v35 = vld [vmem:[%s2914_s4 + $0x8] sm:$0xff]  }
 0x34e   :  { %v798_v52 = vor.u32 %v796_v46, %v795_v42  ;;  %v826_v55 = vsel %vm2644_vm5, %v789_v40, 0  ;;  %v2662_v56 = vsel %vm2644_vm5, %v795_v42, 0  ;;  %v828_v57 = vsel %vm2644_vm5, %v801_v32, 0  ;;  %v2178_v42 = vld [vmem:[%s2914_s4 + $0x10] sm:$0xff]   ;;  %v2179_v46 = vld [vmem:[%s2914_s4 + $0x18] sm:$0xff]  }
 0x34f   :  { %v2652_v53 = vsel %vm2644_vm5, 0, %v810_v44  ;;  %v2656_v54 = vsel %vm2644_vm5, 0, %v792_v51  ;;  %v893_v58 = vshll.u32 %v829_v50, 16  ;;  %v2672_v60 = vsel %vm2644_vm5, 0, %v804_v48  ;;  %v2180_v48 = vld [vmem:[%s2914_s4 + $0x20] sm:$0xff]   ;;  %v2182_v51 = vld [vmem:[%s2914_s4 + $0x30] sm:$0xff]  }
 0x350   :  { %v2668_v59 = vsel %vm2644_vm5, 0, %v798_v52  ;;  %v1153_v61 = vrot.slane %v829_v50, 1  ;;  %v869_v62 = vshll.u32 %v2662_v56, 16  ;;  %v857_v0 = vshll.u32 %v826_v55, 16  ;;  %v2181_v50 = vld [vmem:[%s2914_s4 + $0x28] sm:$0xff]   ;;  %v2183_v52 = vld [vmem:[%s2914_s4 + $0x38] sm:$0xff]  }
 0x351   :  { %v864_v63 = vshll.u32 %v2668_v59, 16  ;;  %v1144_v1 = vrot.slane %v826_v55, 1  ;;  %v852_v2 = vshll.u32 %v2656_v54, 16  ;;  %v888_v5 = vshll.u32 %v2652_v53, 16  ;;  %v2184_v55 = vld [vmem:[%s2914_s4 + $0x40] sm:$0xff]  }
 0x352   :  { %v862_v6 = vshrl.u32 %v2668_v59, 16  ;;  %v850_v8 = vshrl.u32 %v2656_v54, 16  ;;  %v886_v9 = vshrl.u32 %v2652_v53, 16  ;;  %v876_v12 = vshll.u32 %v2672_v60, 16 }
 0x353   :  { %v866_v7 = vrot.slane %v864_v63, 1  ;;  %v854_v11 = vrot.slane %v852_v2, 1  ;;  %v890_v43 = vrot.slane %v888_v5, 1  ;;  %v1143_v13 = vrot.slane %v2656_v54, 1 }
 0x354   :  { %v871_v14 = vrot.slane %v869_v62, 1  ;;  %v1152_v47 = vrot.slane %v2652_v53, 1  ;;  %v1149_v49 = vrot.slane %v2672_v60, 1  ;;  %v859_v16 = vrot.slane %v857_v0, 1  ;;  %v2187_v62 = vld [vmem:[%s2914_s4 + $0xa0] sm:$0xff]   ;;  %v2192_v0 = vld [vmem:[%s2914_s4 + $0xc8] sm:$0xff]  }
 0x355   :  { %v867_v45 = vor.u32 %v866_v7, %v862_v6  ;;  %v855_v17 = vor.u32 %v854_v11, %v850_v8  ;;  %v891_v18 = vor.u32 %v890_v43, %v886_v9  ;;  %v2689_v19 = vsel %vm1142_vm6, %v1143_v13, %v1144_v1  ;;  %v2193_v1 = vld [vmem:[%s2914_s4 + $0xd0] sm:$0xff]  }
 0x356   :  { %v895_v20 = vrot.slane %v893_v58, 1  ;;  %v2693_v23 = vsel %vm1142_vm6, %v1152_v47, %v1153_v61  ;;  %v1150_v25 = vrot.slane %v828_v57, 1  ;;  %v878_v29 = vrot.slane %v876_v12, 1  ;;  %v2186_v58 = vld [vmem:[%s2914_s4 + $0x98] sm:$0xff]  }
 0x357   :  { %v872_v22 = vsel %vm848_vm4, %v867_v45, %v871_v14  ;;  %v860_v28 = vsel %vm848_vm4, %v855_v17, %v859_v16  ;;  %v881_v34 = vshll.u32 %v828_v57, 16  ;;  %v874_v38 = vshrl.u32 %v2672_v60, 16  ;;  %v2185_v57 = vld [vmem:[%s2914_s4 + $0x90] sm:$0xff]  }
 0x358   :  { %1695 = vmatprep.mubr.msk.bf16.mxu0 %vm660_vm10, %v872_v22  ;;  %v896_v31 = vsel %vm848_vm4, %v891_v18, %v895_v20  ;;  %v2699_v32 = vsel %vm1142_vm6, %v1149_v49, %v1150_v25  ;;  %v1146_v61 = vrot.slane %v2668_v59, 1  ;;  %v1147_v63 = vrot.slane %v2662_v56, 1  ;;  %v2189_v56 = vld [vmem:[%s2914_s4 + $0xb0] sm:$0xff]  }
 0x359   :  { %1011 = vmatmul.mubr.bf16.vlgmr.msra.gmra.mrb[4].mxu0 %v860_v28  ;;  %v879_v40 = vor.u32 %v878_v29, %v874_v38  ;;  %v883_v41 = vrot.slane %v881_v34, 1 }
 0x35a   :  { %1086 = vmatpush1.bf16.msra.mxu0 %v2176_v15  ;;  %1696 = vmatprep.mubr.msk.bf16.mxu0 %vm660_vm10, %v896_v31 }
 0x35b   :  { %1087 = vmatprep.subr.bf16.mxu0 %v2216_v39  ;;  %v884_v44 = vsel %vm848_vm4, %v879_v40, %v883_v41 }
 0x35e   :  { %1088 = vmatpush1.bf16.msra.mxu0 %v2177_v35 }
 0x35f   :  { %1089 = vmatprep.subr.bf16.mxu0 %v2216_v39 }
 0x361   :  { %1019 = vmatmul.mubr.bf16.gmra.mrb[8].mxu0 %v884_v44 }
 0x362   :  { %1090 = vmatpush1.bf16.msra.mxu0 %v2178_v42  ;;  %1706 = vmatprep.mubr.msk.bf16.mxu0 %vm660_vm10, %v2668_v59  ;;  %v2190_v59 = vld [vmem:[%s2914_s4 + $0xb8] sm:$0xff]  }
 0x363   :  { %1091 = vmatprep.subr.bf16.mxu0 %v2216_v39 }
 0x366   :  { %1092 = vmatpush1.bf16.msra.mxu0 %v2179_v46 }
 0x367   :  { %1093 = vmatprep.subr.bf16.mxu0 %v2216_v39 }
 0x36a   :  { %1094 = vmatpush1.bf16.msra.mxu0 %v2180_v48 }
 0x36b   :  { %1095 = vmatprep.subr.bf16.mxu0 %v2216_v39 }
 0x36e   :  { %1096 = vmatpush1.bf16.msra.mxu0 %v2181_v50 }
 0x36f   :  { %1097 = vmatprep.subr.bf16.mxu0 %v2216_v39 }
 0x372   :  { %1098 = vmatpush1.bf16.msra.mxu0 %v2182_v51 }
 0x373   :  { %1099 = vmatprep.subr.bf16.mxu0 %v2216_v39 }
 0x376   :  { %1100 = vmatpush1.bf16.msra.mxu0 %v2183_v52 }
 0x377   :  { %1101 = vmatprep.subr.bf16.mxu0 %v2216_v39 }
 0x37a   :  { %1102 = vmatpush1.bf16.msra.mxu0 %v2184_v55 }
 0x37b   :  { %1236 = vmatprep.subr.bf16.mxu0 %v2216_v39 }
 0x37d   :  { %1118 = vmatmul.mubr.bf16.vlgmr.msra.gmra.mrb[4].mxu0 %v2656_v54  ;;  %v2188_v54 = vld [vmem:[%s2914_s4 + $0xa8] sm:$0xff]  }
 0x37e   :  { %1707 = vmatprep.mubr.msk.bf16.mxu0 %vm660_vm10, %v2652_v53  ;;  %1237 = vmatpush1.bf16.msra.mxu0 %v2185_v57  ;;  %v1148_v53 = vsel %vm1142_vm6, %v1146_v61, %v1147_v63 }
 0x37f   :  { %1238 = vmatprep.subr.bf16.mxu0 %v2216_v39 }
 0x382   :  { %1239 = vmatpush1.bf16.msra.mxu0 %v2186_v58 }
 0x383   :  { %1240 = vmatprep.subr.bf16.mxu0 %v2216_v39 }
 0x385   :  { %1126 = vmatmul.mubr.bf16.gmra.mrb[8].mxu0 %v2672_v60  ;;  %v2191_v60 = vld [vmem:[%s2914_s4 + $0xc0] sm:$0xff]  }
 0x386   :  { %1241 = vmatpush1.bf16.msra.mxu0 %v2187_v62  ;;  %1735 = vmatprep.mubr.msk.bf16.mxu0 %vm660_vm10, %v1148_v53 }
 0x387   :  { %1242 = vmatprep.subr.bf16.mxu0 %v2216_v39 }
 0x38a   :  { %1243 = vmatpush1.bf16.msra.mxu0 %v2188_v54 }
 0x38b   :  { %1244 = vmatprep.subr.bf16.mxu0 %v2216_v39 }
 0x38e   :  { %1245 = vmatpush1.bf16.msra.mxu0 %v2189_v56 }
 0x38f   :  { %1246 = vmatprep.subr.bf16.mxu0 %v2216_v39 }
 0x392   :  { %1247 = vmatpush1.bf16.msra.mxu0 %v2190_v59 }
 0x393   :  { %1248 = vmatprep.subr.bf16.mxu0 %v2216_v39 }
 0x396   :  { %1249 = vmatpush1.bf16.msra.mxu0 %v2191_v60 }
 0x397   :  { %1250 = vmatprep.subr.bf16.mxu0 %v2216_v39 }
 0x39a   :  { %1251 = vmatpush1.bf16.msra.mxu0 %v2192_v0 }
 0x39b   :  { %1252 = vmatprep.subr.bf16.mxu0 %v2216_v39 }
 0x39e   :  { %1253 = vmatpush1.bf16.msra.mxu0 %v2193_v1 }
 0x3a1   :  { %1269 = vmatmul.mubr.bf16.vlgmr.msra.gmra.mrb[4].mxu0 %v2689_v19 }
 0x3a2   :  { %1736 = vmatprep.mubr.msk.bf16.mxu0 %vm660_vm10, %v2693_v23 }
 0x3a9   :  { %1277 = vmatmul.mubr.bf16.gmra.mrb[8].mxu0 %v2699_v32 }
 0x474   :  { %v2786_v2 = vpop.f32.mrb[4].mxu0 }
 0x475   :  { %v1272_v5 = vpop.f32.mrb[5].mxu0  ;;  %v1298_v7 = vmul.f32 %v2786_v2, %v2786_v2 }
 0x476   :  { %v2788_v6 = vpop.f32.mrb[6].mxu0 }
 0x477   :  { %v1289_v8 = vadd.f32 %v2788_v6, %v2786_v2  ;;  %v1299_v39 = vmul.f32 %v2788_v6, %v2788_v6  ;;  %v1275_v9 = vpop.f32.mrb[7].mxu0 }
 0x479   :  { %v1302_v11 = vadd.f32 %v1299_v39, %v1298_v7 }
 0x47c   :  { %v2796_v43 = vpop.f32.mrb[8].mxu0 }
 0x47d   :  { %v1290_v12 = vadd.f32 %v1289_v8, %v2796_v43  ;;  %v1300_v13 = vmul.f32 %v2796_v43, %v2796_v43  ;;  %v1280_v14 = vpop.f32.mrb[9].mxu0 }
 0x47e   :  { %v2801_v45 = vpop.f32.mrb[10].mxu0 }
 0x47f   :  { %v1303_v47 = vadd.f32 %v1302_v11, %v1300_v13  ;;  %v1291_v49 = vadd.f32 %v1290_v12, %v2801_v45  ;;  %v1301_v16 = vmul.f32 %v2801_v45, %v2801_v45  ;;  %v1283_v17 = vpop.f32.mrb[11].mxu0 }
 0x481   :  { %v1292_v15 = vrot.slane %v1291_v49, 4  ;;  %v1304_v18 = vadd.f32 %v1303_v47, %v1301_v16 }
 0x483   :  { %v1293_v19 = vadd.f32 %v1292_v15, %v1291_v49  ;;  %v1305_v28 = vrot.slane %v1304_v18, 4 }
 0x485   :  { %v1294_v20 = vrot.slane %v1293_v19, 2  ;;  %v1306_v29 = vadd.f32 %v1305_v28, %v1304_v18 }
 0x487   :  { %v1295_v22 = vadd.f32 %v1294_v20, %v1293_v19 }
 0x489   :  { %v1296_v23 = vrot.slane %v1295_v22, 1 }
 0x48b   :  { %v1297_v25 = vadd.f32 %v1296_v23, %v1295_v22 }
 0x48d   :  { %1971 = vmatmul.mubr.f32.vlgmr.msra.gmra.mrb[8].mxu1 %v1297_v25 }
 0x48e   :  { %2082 = vmatpush3.bf16.msra.mxu1 %v2368_v4  ;;  %2005 = vmatprep.mubr.msk.f32.mxu1 %vm2199_vm8, %v2200_v36  ;;  %v1307_v4 = vrot.slane %v1306_v29, 2  ;;  %vm2928_vm8 = vcmask 785408  }
 0x48f   :  { %2083 = vmatprep.subr.bf16.mxu1 %v2198_v3 }
 0x492   :  { %2085 = vmatpush3.bf16.msra.mxu1 %v2382_v10  ;;  %v1308_v10 = vadd.f32 %v1307_v4, %v1306_v29 }
 0x493   :  { %2086 = vmatprep.subr.bf16.mxu1 %v2198_v3 }
 0x496   :  { %2088 = vmatpush3.bf16.msra.mxu1 %v2404_v21  ;;  %v1309_v21 = vrot.slane %v1308_v10, 1 }
 0x497   :  { %2089 = vmatprep.subr.bf16.mxu1 %v2198_v3 }
 0x49a   :  { %2091 = vmatpush3.bf16.msra.mxu1 %v2414_v24  ;;  %v1310_v24 = vadd.f32 %v1309_v21, %v1308_v10 }
 0x49b   :  { %2092 = vmatprep.subr.bf16.mxu1 %v2198_v3 }
 0x49e   :  { %2094 = vmatpush3.bf16.msra.mxu1 %v2424_v27 }
 0x49f   :  { %2095 = vmatprep.subr.bf16.mxu1 %v2198_v3 }
 0x4a2   :  { %2097 = vmatpush3.bf16.msra.mxu1 %v2434_v30 }
 0x4a3   :  { %2098 = vmatprep.subr.bf16.mxu1 %v2198_v3 }
 0x4a6   :  { %2100 = vmatpush3.bf16.msra.mxu1 %v2444_v33 }
 0x4a7   :  { %2101 = vmatprep.subr.bf16.mxu1 %v2198_v3  ;;  %v1456_v3 = vld [vmem:[%s2915_s5] sm:$0x1] }
 0x4aa   :  { %2103 = vmatpush3.bf16.msra.mxu1 %v2455_v37  ;;  %v1460_v37 = vld [vmem:[%s2916_s6] sm:$0x1] }
 0x4ad   :  { %2006 = vmatmul.mubr.f32.vlgmr.msra.gmra.mrb[10].mxu1 %v1310_v24 }
 0x560   :  { %v1377_v36 = vpop.f32.mrb[8].mxu1 }
 0x561   :  { %v1972_v31 = vpop.f32.mrb[9].mxu1  ;;  %v1451_v27 = vmul.f32 0.001953125, %v1377_v36 }
 0x563   :  { %v1453_v34 = vmul.f32 %v1451_v27, %v1451_v27 }
 0x580   :  { %v1447_v32 = vpop.f32.mrb[10].mxu1 }
 0x581   :  { %v1452_v35 = vmul.f32 0.001953125, %v1447_v32  ;;  %v2007_v38 = vpop.f32.mrb[11].mxu1 }
 0x583   :  { %v1454_v30 = vsub.f32 %v1452_v35, %v1453_v34 }
 0x585   :  { %v1455_v40 = vmax.f32 %v1454_v30, 0.0 }
 0x587   :  { %v1457_v41 = vadd.f32 1e-05, %v1455_v40 }
 0x589   :  { %2196 = vrsqrt.f32 %v1457_v41 }
 0x593   :  { %v2197_v33 = vpop.eup %2196 }
 0x594   :  { %v1459_v42 = vmul.f32 %v2197_v33, %v1456_v3 }
 0x596   :  { %v1461_v44 = vmul.f32 %v1459_v42, %v1451_v27  ;;  %v1467_v46 = vrot.slane %v1459_v42, %v2519_v26 }
 0x598   :  { %v1462_v48 = vsub.f32 %v1460_v37, %v1461_v44  ;;  %1471 = vrot.lane.b32.xlu1 %v1467_v46, %s2203_s13  ;;  %1468 = vrot.lane.b32.xlu0 %v1467_v46, %s2202_s2 }
 0x59a   :  { %v1532_v50 = vrot.slane %v1462_v48, %v2519_v26 }
 0x59c   :  { %1474 = vrot.lane.b32.xlu0 %v1467_v46, %s2201_s12  ;;  %1533 = vrot.lane.b32.xlu1 %v1532_v50, %s2202_s2 }
 0x5a0   :  { %1477 = vrot.lane.b32.xlu0 %v1467_v46, %s2204_s3  ;;  %1536 = vrot.lane.b32.xlu1 %v1532_v50, %s2203_s13 }
 0x5a4   :  { %1480 = vrot.lane.b32.xlu0 %v1467_v46, %s2205_s14  ;;  %1539 = vrot.lane.b32.xlu1 %v1532_v50, %s2201_s12 }
 0x5a8   :  { %1483 = vrot.lane.b32.xlu0 %v1467_v46, %s2206_s15  ;;  %1542 = vrot.lane.b32.xlu1 %v1532_v50, %s2204_s3 }
 0x5ac   :  { %1486 = vrot.lane.b32.xlu0 %v1467_v46, %s2207_s16  ;;  %1545 = vrot.lane.b32.xlu1 %v1532_v50, %s2205_s14 }
 0x5b0   :  { %1489 = vrot.lane.b32.xlu0 %v1467_v46, %s2208_s17  ;;  %1548 = vrot.lane.b32.xlu1 %v1532_v50, %s2206_s15 }
 0x5b4   :  { %1492 = vrot.lane.b32.xlu0 %v1467_v46, %s2209_s18  ;;  %1551 = vrot.lane.b32.xlu1 %v1532_v50, %s2207_s16 }
 0x5b8   :  { %1495 = vrot.lane.b32.xlu0 %v1467_v46, %s2210_s0  ;;  %1554 = vrot.lane.b32.xlu1 %v1532_v50, %s2208_s17 }
 0x5bc   :  { %1498 = vrot.lane.b32.xlu0 %v1467_v46, %s2211_s19  ;;  %1557 = vrot.lane.b32.xlu1 %v1532_v50, %s2209_s18 }
 0x5c0   :  { %1501 = vrot.lane.b32.xlu0 %v1467_v46, %s2212_s20  ;;  %1560 = vrot.lane.b32.xlu1 %v1532_v50, %s2210_s0 }
 0x5c4   :  { %1504 = vrot.lane.b32.xlu0 %v1467_v46, %s2213_s21  ;;  %1563 = vrot.lane.b32.xlu1 %v1532_v50, %s2211_s19 }
 0x5c8   :  { %1507 = vrot.lane.b32.xlu0 %v1467_v46, %s2214_s22  ;;  %1566 = vrot.lane.b32.xlu1 %v1532_v50, %s2212_s20 }
 0x5cc   :  { %1510 = vrot.lane.b32.xlu0 %v1467_v46, %s2215_s23  ;;  %1569 = vrot.lane.b32.xlu1 %v1532_v50, %s2213_s21 }
 0x5d0   :  { %1572 = vrot.lane.b32.xlu0 %v1532_v50, %s2214_s22  ;;  %1575 = vrot.lane.b32.xlu1 %v1532_v50, %s2215_s23 }
 0x60a   :  { %v1472_v51 = vpop.permute.xlu1 %1471  ;;  %v1469_v52 = vpop.permute.xlu0 %1468 }
 0x60b   :  { %v1513_v11 = vsel %vm658_vm9, %v1459_v42, %v1469_v52 }
 0x60c   :  { %v1514_v12 = vsel %vm660_vm10, %v1513_v11, %v1472_v51 }
 0x60e   :  { %v1475_v55 = vpop.permute.xlu0 %1474  ;;  %v1534_v57 = vpop.permute.xlu1 %1533 }
 0x60f   :  { %v1515_v47 = vsel %vm662_vm11, %v1514_v12, %v1475_v55  ;;  %v1578_v17 = vsel %vm658_vm9, %v1462_v48, %v1534_v57  ;;  %vm2929_vm9 = vcmask 850944  }
 0x612   :  { %v1478_v58 = vpop.permute.xlu0 %1477  ;;  %v1537_v61 = vpop.permute.xlu1 %1536 }
 0x613   :  { %v1516_v49 = vsel %vm664_vm12, %v1515_v47, %v1478_v58  ;;  %v1579_v20 = vsel %vm660_vm10, %v1578_v17, %v1537_v61  ;;  %vm2930_vm10 = vcmask 916480  }
 0x616   :  { %v1481_v62 = vpop.permute.xlu0 %1480  ;;  %v1540_v63 = vpop.permute.xlu1 %1539 }
 0x617   :  { %v1517_v16 = vsel %vm666_vm13, %v1516_v49, %v1481_v62  ;;  %v1580_v23 = vsel %vm662_vm11, %v1579_v20, %v1540_v63  ;;  %vm2931_vm11 = vcmask 982016  }
 0x61a   :  { %v1484_v53 = vpop.permute.xlu0 %1483  ;;  %v1543_v54 = vpop.permute.xlu1 %1542 }
 0x61b   :  { %v1518_v15 = vsel %vm668_vm14, %v1517_v16, %v1484_v53  ;;  %v1581_v28 = vsel %vm664_vm12, %v1580_v23, %v1543_v54  ;;  %vm2932_vm12 = vmmov %vm2928_vm8 }
 0x61e   :  { %v1487_v56 = vpop.permute.xlu0 %1486  ;;  %v1546_v59 = vpop.permute.xlu1 %1545 }
 0x61f   :  { %v1519_v22 = vsel %vm670_vm15, %v1518_v15, %v1487_v56  ;;  %v1582_v4 = vsel %vm666_vm13, %v1581_v28, %v1546_v59  ;;  %vm2933_vm13 = vmmov %vm2929_vm9 }
 0x622   :  { %v1490_v60 = vpop.permute.xlu0 %1489  ;;  %v1549_v0 = vpop.permute.xlu1 %1548 }
 0x623   :  { %v1520_v25 = vsel %vm672_vm0, %v1519_v22, %v1490_v60  ;;  %v1583_v36 = vsel %vm668_vm14, %v1582_v4, %v1549_v0  ;;  %vm2934_vm14 = vmmov %vm2930_vm10 }
 0x626   :  { %v1493_v1 = vpop.permute.xlu0 %1492  ;;  %v1552_v5 = vpop.permute.xlu1 %1551 }
 0x627   :  { %v1521_v29 = vsel %vm155_vm1, %v1520_v25, %v1493_v1  ;;  %v1584_v27 = vsel %vm670_vm15, %v1583_v36, %v1552_v5 }
 0x62a   :  { %v1496_v7 = vpop.permute.xlu0 %1495  ;;  %v1555_v8 = vpop.permute.xlu1 %1554 }
 0x62b   :  { %v1522_v10 = vsel %vm675_vm2, %v1521_v29, %v1496_v7  ;;  %v1585_v34 = vsel %vm672_vm0, %v1584_v27, %v1555_v8 }
 0x62e   :  { %v1499_v39 = vpop.permute.xlu0 %1498  ;;  %v1558_v9 = vpop.permute.xlu1 %1557 }
 0x62f   :  { %v1523_v31 = vsel %vm677_vm3, %v1522_v10, %v1499_v39  ;;  %v1586_v38 = vsel %vm155_vm1, %v1585_v34, %v1558_v9  ;;  %vm2935_vm1 = vmmov %vm2931_vm11 }
 0x632   :  { %v1502_v13 = vpop.permute.xlu0 %1501  ;;  %v1561_v14 = vpop.permute.xlu1 %1560 }
 0x633   :  { %v1524_v32 = vsel %vm2928_vm8, %v1523_v31, %v1502_v13  ;;  %v1587_v3 = vsel %vm675_vm2, %v1586_v38, %v1561_v14 }
 0x636   :  { %v1505_v18 = vpop.permute.xlu0 %1504  ;;  %v1564_v19 = vpop.permute.xlu1 %1563 }
 0x637   :  { %v1525_v35 = vsel %vm2929_vm9, %v1524_v32, %v1505_v18  ;;  %v1588_v42 = vsel %vm677_vm3, %v1587_v3, %v1564_v19 }
 0x63a   :  { %v1508_v21 = vpop.permute.xlu0 %1507  ;;  %v1567_v24 = vpop.permute.xlu1 %1566 }
 0x63b   :  { %v1526_v30 = vsel %vm2930_vm10, %v1525_v35, %v1508_v21  ;;  %v1589_v44 = vsel %vm2932_vm12, %v1588_v42, %v1567_v24 }
 0x63e   :  { %v1511_v40 = vpop.permute.xlu0 %1510  ;;  %v1570_v41 = vpop.permute.xlu1 %1569 }
 0x63f   :  { %v1527_v33 = vsel %vm2931_vm11, %v1526_v30, %v1511_v40  ;;  %v1590_v46 = vsel %vm2933_vm13, %v1589_v44, %v1570_v41 }
 0x640   :  { %v1596_v37 = vrot.slane %v1527_v33, %v2519_v26 }
 0x642   :  { %v1573_v48 = vpop.permute.xlu0 %1572  ;;  %v1576_v50 = vpop.permute.xlu1 %1575  ;;  %v1597_v52 = vmul.f32 %v1596_v37, %v2786_v2  ;;  %v1598_v57 = vmul.f32 %v1596_v37, %v2788_v6  ;;  %v1599_v58 = vmul.f32 %v1596_v37, %v2796_v43  ;;  %v1600_v61 = vmul.f32 %v1596_v37, %v2801_v45 }
 0x643   :  { %v1591_v51 = vsel %vm2934_vm14, %v1590_v46, %v1573_v48 }
 0x644   :  { %v1592_v55 = vsel %vm2935_vm1, %v1591_v51, %v1576_v50 }
 0x645   :  { %v1604_v62 = vrot.slane %v1592_v55, %v2519_v26 }
 0x647   :  { %v1605_v63 = vadd.f32 %v1604_v62, %v1597_v52  ;;  %v1606_v53 = vadd.f32 %v1604_v62, %v1598_v57  ;;  %v1607_v54 = vadd.f32 %v1604_v62, %v1599_v58  ;;  %v1608_v56 = vadd.f32 %v1604_v62, %v1600_v61 }
 0x649   :  { %v1609_v59 = vmax.f32 %v1605_v63, 0.0  ;;  %v1610_v60 = vmax.f32 %v1606_v53, 0.0  ;;  %v1611_v0 = vmax.f32 %v1607_v54, 0.0  ;;  %v1612_v1 = vmax.f32 %v1608_v56, 0.0 }
 0x64b   :  { %1613 = vst [vmem:[%s2917_s8] sm:$0xff] %v1609_v59  ;;  %1614 = vst [vmem:[%s2917_s8 + $0x8] sm:$0xff] %v1610_v60 }
 0x64c   :  { %1615 = vst [vmem:[%s2917_s8 + $0x10] sm:$0xff] %v1611_v0  ;;  %1616 = vst [vmem:[%s2917_s8 + $0x18] sm:$0xff] %v1612_v1 }

</bundles_post_ra>
